<compile_context>
chip_gen: v5e
topology: v5e:2x2
jax: 0.10.0
libtpu: 0.0.40
codegen_flags: <defaults>
</compile_context>

<pallas_src>
import jax
import jax.numpy as jnp
from jax import lax
from jax.experimental import pallas as pl
from jax.experimental.pallas import tpu as pltpu


SELU_ALPHA = 1.6732632423543772
SELU_SCALE = 1.0507009873554804


def _selu_unscaled(x):
    # SELU(x) / SELU_SCALE.  The scale factor is folded into the *next*
    # layer's weights at parameter-prep time.  min(x, 0) keeps the EUP input
    # bounded (no inf on the discarded branch).  exp() is used instead of
    # expm1() for guaranteed Mosaic lowering; abs error vs expm1 is ~1e-7.
    return jnp.where(x > 0.0, x, SELU_ALPHA * (jnp.exp(jnp.minimum(x, 0.0)) - 1.0))


def classifier_kernel(x_ref, w1t_ref, b1_ref, w2t_ref, b2_ref, w3c_ref, b3_ref,
                      prob_ref, logr_ref):
    # fc1: contract the feature dim of both operands -> (80, TB).
    # (MXU handles the A @ B^T form; batch lands on lanes from here on.)
    h1 = lax.dot_general(
        w1t_ref[...], x_ref[...],
        dimension_numbers=(((1,), (1,)), ((), ())),
        preferred_element_type=jnp.float32)                       # (80, TB)
    h1 = _selu_unscaled(h1 + b1_ref[...])                         # b1 (80,1) lane-bcast

    # fc2 (+ folded SELU scale): (30,80) @ (80,TB) -> (30,TB)
    h2 = jnp.dot(w2t_ref[...], h1, preferred_element_type=jnp.float32)
    h2 = _selu_unscaled(h2 + b2_ref[...])

    # fc3: single output unit -> VPU multiply + sublane (XLU) reduce.
    logr = jnp.sum(h2 * w3c_ref[...], axis=0, keepdims=True) + b3_ref[...]   # (1,TB)

    # Exact sigmoid (previous approx reciprocal was not accurate enough).
    prob = 1.0 / (1.0 + jnp.exp(-logr))

    # Full-block, lane-dense stores.
    prob_ref[...] = prob
    logr_ref[...] = logr


def _round_up(n, m):
    return ((n + m - 1) // m) * m


def classifier_forward(x, kernel_params, *, block_b=2048):
    """x: (B, 13) float32.  Returns (sigmoid(logr), logr), each (B, 1)."""
    w1t, b1, w2t_s, b2, w3c_s, b3 = kernel_params
    B, F = x.shape
    assert F == 13

    # Tile: big enough to amortize per-grid-step overhead, small enough that
    # the "parallel" grid has >=2 steps (both v7x TensorCores busy) and VMEM
    # stays tiny on every generation (incl. v5e's 16 MiB scoped default).
    tb = min(block_b, _round_up(max(pl.cdiv(B, 2), 1), 128))
    nb = pl.cdiv(B, tb)          # ragged tail handled by Pallas boundary blocks

    prob, logr = pl.pallas_call(
        classifier_kernel,
        out_shape=(jax.ShapeDtypeStruct((1, B), jnp.float32),
                   jax.ShapeDtypeStruct((1, B), jnp.float32)),
        grid_spec=pltpu.PrefetchScalarGridSpec(
            num_scalar_prefetch=0,
            grid=(nb,),
            in_specs=[
                pl.BlockSpec((tb, 13), lambda i: (i, 0)),   # x tile (pipelined)
                pl.BlockSpec((80, 13), lambda i: (0, 0)),   # W1^T        (resident)
                pl.BlockSpec((80, 1), lambda i: (0, 0)),    # b1
                pl.BlockSpec((30, 80), lambda i: (0, 0)),   # scale*W2^T  (resident)
                pl.BlockSpec((30, 1), lambda i: (0, 0)),    # b2
                pl.BlockSpec((30, 1), lambda i: (0, 0)),    # scale*w3 column
                pl.BlockSpec((1, 1), lambda i: (0, 0)),     # b3
            ],
            out_specs=[
                pl.BlockSpec((1, tb), lambda i: (0, i)),    # prob (lane-dense)
                pl.BlockSpec((1, tb), lambda i: (0, i)),    # logr (lane-dense)
            ],
        ),
        compiler_params=pltpu.CompilerParams(
            dimension_semantics=("parallel",),   # v7x: shard batch over 2 TCs
        ),
    )(x, w1t, b1, w2t_s, b2, w3c_s, b3)

    # (1, B) -> (B, 1): same linear element order => metadata-only reshape.
    return prob.reshape(B, 1), logr.reshape(B, 1)


classifier_forward_jit = jax.jit(classifier_forward, static_argnames=("block_b",))


def init_params(key):
    """PyTorch-style parameters (nn.Linear uniform(-1/sqrt(fan_in), ...)):
       W1 (80,13), b1 (80,), W2 (30,80), b2 (30,), W3 (1,30), b3 (1,)."""
    ks = jax.random.split(key, 6)

    def lin(kw, kb, fan_in, fan_out):
        bound = 1.0 / jnp.sqrt(fan_in)
        w = jax.random.uniform(kw, (fan_out, fan_in), jnp.float32, -bound, bound)
        b = jax.random.uniform(kb, (fan_out,), jnp.float32, -bound, bound)
        return w, b

    w1, b1 = lin(ks[0], ks[1], 13, 80)
    w2, b2 = lin(ks[2], ks[3], 80, 30)
    w3, b3 = lin(ks[4], ks[5], 30, 1)
    return (w1, b1, w2, b2, w3, b3)


def prepare_kernel_params(params):
    """Kernel layout: biases as columns, SELU scale folded into the *next*
    layer's weights so the in-kernel SELU skips the final multiply."""
    w1, b1, w2, b2, w3, b3 = params
    return (
        w1,                                         # (80, 13)
        b1.reshape(80, 1),
        (SELU_SCALE * w2).astype(jnp.float32),      # (30, 80)
        b2.reshape(30, 1),
        (SELU_SCALE * w3.T).astype(jnp.float32),    # (30, 1)
        b3.reshape(1, 1),
    )


def reference_forward(x, params):
    """Pure-JAX reference with the original (unscaled) parameters."""
    w1, b1, w2, b2, w3, b3 = params
    h1 = jax.nn.selu(x @ w1.T + b1)
    h2 = jax.nn.selu(h1 @ w2.T + b2)
    logr = h2 @ w3.T + b3
    prob = 1.0 / (1.0 + jnp.exp(-logr))
    return prob, logr


if __name__ == "__main__":
    key = jax.random.PRNGKey(0)
    k_params, k_x = jax.random.split(key)

    params = init_params(k_params)
    kparams = prepare_kernel_params(params)

    # input = concat(x[8 dims], theta[5 dims]) -> 13 features.
    # batch=200 with block_b=128 -> 2 grid steps + a ragged 72-row tail block.
    batch = 200
    x = jax.random.normal(k_x, (batch, 13), dtype=jnp.float32)

    prob, logr = classifier_forward_jit(x, kparams, block_b=128)
    prob = jax.block_until_ready(prob)
    logr = jax.block_until_ready(logr)

    prob_ref, logr_ref = reference_forward(x, params)
    assert prob.shape == (batch, 1) and logr.shape == (batch, 1)

    # Tolerances allow for default-precision f32 matmul decomposition on the
    # MXU (Mosaic) vs XLA's default f32-dot handling; genuine layout/weight
    # bugs produce O(0.1-1) errors and are still caught.
    err_logr = float(jnp.max(jnp.abs(logr - logr_ref)))
    err_prob = float(jnp.max(jnp.abs(prob - prob_ref)))
    assert jnp.allclose(logr, logr_ref, atol=5e-3, rtol=5e-3), f"logr max err {err_logr}"
    assert jnp.allclose(prob, prob_ref, atol=5e-3, rtol=5e-3), f"prob max err {err_prob}"

    print("KERNEL_OK")
</pallas_src>

<mosaic_0001>
module attributes {stable_mosaic.version = 11 : i64} {
  func.func @classifier_kernel(%arg0: i32, %arg1: memref<128x13xf32, #tpu.memory_space<vmem>>, %arg2: memref<80x13xf32, #tpu.memory_space<vmem>>, %arg3: memref<80x1xf32, #tpu.memory_space<vmem>>, %arg4: memref<30x80xf32, #tpu.memory_space<vmem>>, %arg5: memref<30x1xf32, #tpu.memory_space<vmem>>, %arg6: memref<30x1xf32, #tpu.memory_space<vmem>>, %arg7: memref<1x1xf32, #tpu.memory_space<vmem>>, %arg8: memref<1x128xf32, #tpu.memory_space<vmem>>, %arg9: memref<1x128xf32, #tpu.memory_space<vmem>>) attributes {dimension_semantics = [#tpu.dimension_semantics<parallel>], iteration_bounds = array<i64: 2>, scalar_prefetch = 0 : i64, scratch_operands = 0 : i64, tpu.core_type = #tpu.core_type<tc>, window_params = [{transform_indices = @transform_0, window_bounds = array<i64: 128, 13>}, {pipeline_mode = #tpu.pipeline_mode<synchronous>, transform_indices = @transform_1, window_bounds = array<i64: 80, 13>}, {pipeline_mode = #tpu.pipeline_mode<synchronous>, transform_indices = @transform_2, window_bounds = array<i64: 80, 1>}, {pipeline_mode = #tpu.pipeline_mode<synchronous>, transform_indices = @transform_3, window_bounds = array<i64: 30, 80>}, {pipeline_mode = #tpu.pipeline_mode<synchronous>, transform_indices = @transform_4, window_bounds = array<i64: 30, 1>}, {pipeline_mode = #tpu.pipeline_mode<synchronous>, transform_indices = @transform_5, window_bounds = array<i64: 30, 1>}, {pipeline_mode = #tpu.pipeline_mode<synchronous>, transform_indices = @transform_6, window_bounds = array<i64: 1, 1>}, {transform_indices = @transform_7, window_bounds = array<i64: 1, 128>}, {transform_indices = @transform_8, window_bounds = array<i64: 1, 128>}]} {
    %c0 = arith.constant 0 : index
    %c0_0 = arith.constant 0 : index
    %0 = vector.load %arg2[%c0, %c0_0] : memref<80x13xf32, #tpu.memory_space<vmem>>, vector<80x13xf32>
    %c0_1 = arith.constant 0 : index
    %c0_2 = arith.constant 0 : index
    %1 = vector.load %arg1[%c0_1, %c0_2] : memref<128x13xf32, #tpu.memory_space<vmem>>, vector<128x13xf32>
    %cst = arith.constant dense<0.000000e+00> : vector<80x128xf32>
    %2 = tpu.matmul %0, %1, %cst {dimension_numbers = #tpu.dot_dimension_numbers<[1], [1], [0], [0], [0, 0, 1, 0], [], []>} : vector<80x13xf32>, vector<128x13xf32>, vector<80x128xf32> -> vector<80x128xf32>
    %c0_3 = arith.constant 0 : index
    %c0_4 = arith.constant 0 : index
    %3 = vector.load %arg3[%c0_3, %c0_4] : memref<80x1xf32, #tpu.memory_space<vmem>>, vector<80x1xf32>
    %4 = vector.broadcast %3 : vector<80x1xf32> to vector<80x128xf32>
    %5 = arith.addf %2, %4 : vector<80x128xf32>
    %cst_5 = arith.constant 0.000000e+00 : f32
    %6 = vector.broadcast %cst_5 : f32 to vector<80x128xf32>
    %7 = arith.cmpf ogt, %5, %6 : vector<80x128xf32>
    %cst_6 = arith.constant 0.000000e+00 : f32
    %8 = vector.broadcast %cst_6 : f32 to vector<80x128xf32>
    %9 = arith.minimumf %5, %8 : vector<80x128xf32>
    %10 = math.exp %9 : vector<80x128xf32>
    %cst_7 = arith.constant 1.000000e+00 : f32
    %11 = vector.broadcast %cst_7 : f32 to vector<80x128xf32>
    %12 = arith.subf %10, %11 : vector<80x128xf32>
    %cst_8 = arith.constant 1.67326319 : f32
    %13 = vector.broadcast %cst_8 : f32 to vector<80x128xf32>
    %14 = arith.mulf %13, %12 : vector<80x128xf32>
    %15 = arith.select %7, %5, %14 : vector<80x128xi1>, vector<80x128xf32>
    %c0_9 = arith.constant 0 : index
    %c0_10 = arith.constant 0 : index
    %16 = vector.load %arg4[%c0_9, %c0_10] : memref<30x80xf32, #tpu.memory_space<vmem>>, vector<30x80xf32>
    %cst_11 = arith.constant dense<0.000000e+00> : vector<30x128xf32>
    %17 = tpu.matmul %16, %15, %cst_11 {dimension_numbers = #tpu.dot_dimension_numbers<[1], [0], [0], [1], [0, 0, 1, 1], [], []>} : vector<30x80xf32>, vector<80x128xf32>, vector<30x128xf32> -> vector<30x128xf32>
    %c0_12 = arith.constant 0 : index
    %c0_13 = arith.constant 0 : index
    %18 = vector.load %arg5[%c0_12, %c0_13] : memref<30x1xf32, #tpu.memory_space<vmem>>, vector<30x1xf32>
    %19 = vector.broadcast %18 : vector<30x1xf32> to vector<30x128xf32>
    %20 = arith.addf %17, %19 : vector<30x128xf32>
    %cst_14 = arith.constant 0.000000e+00 : f32
    %21 = vector.broadcast %cst_14 : f32 to vector<30x128xf32>
    %22 = arith.cmpf ogt, %20, %21 : vector<30x128xf32>
    %cst_15 = arith.constant 0.000000e+00 : f32
    %23 = vector.broadcast %cst_15 : f32 to vector<30x128xf32>
    %24 = arith.minimumf %20, %23 : vector<30x128xf32>
    %25 = math.exp %24 : vector<30x128xf32>
    %cst_16 = arith.constant 1.000000e+00 : f32
    %26 = vector.broadcast %cst_16 : f32 to vector<30x128xf32>
    %27 = arith.subf %25, %26 : vector<30x128xf32>
    %cst_17 = arith.constant 1.67326319 : f32
    %28 = vector.broadcast %cst_17 : f32 to vector<30x128xf32>
    %29 = arith.mulf %28, %27 : vector<30x128xf32>
    %30 = arith.select %22, %20, %29 : vector<30x128xi1>, vector<30x128xf32>
    %c0_18 = arith.constant 0 : index
    %c0_19 = arith.constant 0 : index
    %31 = vector.load %arg6[%c0_18, %c0_19] : memref<30x1xf32, #tpu.memory_space<vmem>>, vector<30x1xf32>
    %32 = vector.broadcast %31 : vector<30x1xf32> to vector<30x128xf32>
    %33 = arith.mulf %30, %32 : vector<30x128xf32>
    %cst_20 = arith.constant dense<0.000000e+00> : vector<128xf32>
    %34 = vector.multi_reduction <add>, %33, %cst_20 [0] : vector<30x128xf32> to vector<128xf32>
    %35 = vector.shape_cast %34 : vector<128xf32> to vector<1x128xf32>
    %c0_21 = arith.constant 0 : index
    %c0_22 = arith.constant 0 : index
    %36 = vector.load %arg7[%c0_21, %c0_22] : memref<1x1xf32, #tpu.memory_space<vmem>>, vector<1x1xf32>
    %37 = vector.broadcast %36 : vector<1x1xf32> to vector<1x128xf32>
    %38 = arith.addf %35, %37 : vector<1x128xf32>
    %cst_23 = arith.constant 0.000000e+00 : f32
    %39 = vector.broadcast %cst_23 : f32 to vector<1x128xf32>
    %40 = arith.subf %39, %38 : vector<1x128xf32>
    %41 = math.exp %40 : vector<1x128xf32>
    %cst_24 = arith.constant 1.000000e+00 : f32
    %42 = vector.broadcast %cst_24 : f32 to vector<1x128xf32>
    %43 = arith.addf %42, %41 : vector<1x128xf32>
    %cst_25 = arith.constant 1.000000e+00 : f32
    %44 = vector.broadcast %cst_25 : f32 to vector<1x128xf32>
    %45 = arith.divf %44, %43 : vector<1x128xf32>
    %c0_26 = arith.constant 0 : index
    %c0_27 = arith.constant 0 : index
    %46 = vector.load %arg8[%c0_26, %c0_27] : memref<1x128xf32, #tpu.memory_space<vmem>>, vector<1x128xf32>
    tpu.vector_store %arg8[%c0_26, %c0_27], %45 {strides = array<i32>} : memref<1x128xf32, #tpu.memory_space<vmem>>, vector<1x128xf32>,
    %c0_28 = arith.constant 0 : index
    %c0_29 = arith.constant 0 : index
    %47 = vector.load %arg9[%c0_28, %c0_29] : memref<1x128xf32, #tpu.memory_space<vmem>>, vector<1x128xf32>
    tpu.vector_store %arg9[%c0_28, %c0_29], %38 {strides = array<i32>} : memref<1x128xf32, #tpu.memory_space<vmem>>, vector<1x128xf32>,
    return
  }
  func.func @transform_0(%arg0: i32) -> (i32, i32) {
    %c0_i32 = arith.constant 0 : i32
    %c0_i32_0 = arith.constant 0 : i32
    return %arg0, %c0_i32 : i32, i32
  }
  func.func @transform_1(%arg0: i32) -> (i32, i32) {
    %c0_i32 = arith.constant 0 : i32
    %c0_i32_0 = arith.constant 0 : i32
    %c0_i32_1 = arith.constant 0 : i32
    return %c0_i32, %c0_i32_0 : i32, i32
  }
  func.func @transform_2(%arg0: i32) -> (i32, i32) {
    %c0_i32 = arith.constant 0 : i32
    %c0_i32_0 = arith.constant 0 : i32
    %c0_i32_1 = arith.constant 0 : i32
    return %c0_i32, %c0_i32_0 : i32, i32
  }
  func.func @transform_3(%arg0: i32) -> (i32, i32) {
    %c0_i32 = arith.constant 0 : i32
    %c0_i32_0 = arith.constant 0 : i32
    %c0_i32_1 = arith.constant 0 : i32
    return %c0_i32, %c0_i32_0 : i32, i32
  }
  func.func @transform_4(%arg0: i32) -> (i32, i32) {
    %c0_i32 = arith.constant 0 : i32
    %c0_i32_0 = arith.constant 0 : i32
    %c0_i32_1 = arith.constant 0 : i32
    return %c0_i32, %c0_i32_0 : i32, i32
  }
  func.func @transform_5(%arg0: i32) -> (i32, i32) {
    %c0_i32 = arith.constant 0 : i32
    %c0_i32_0 = arith.constant 0 : i32
    %c0_i32_1 = arith.constant 0 : i32
    return %c0_i32, %c0_i32_0 : i32, i32
  }
  func.func @transform_6(%arg0: i32) -> (i32, i32) {
    %c0_i32 = arith.constant 0 : i32
    %c0_i32_0 = arith.constant 0 : i32
    %c0_i32_1 = arith.constant 0 : i32
    return %c0_i32, %c0_i32_0 : i32, i32
  }
  func.func @transform_7(%arg0: i32) -> (i32, i32) {
    %c0_i32 = arith.constant 0 : i32
    %c0_i32_0 = arith.constant 0 : i32
    return %c0_i32, %arg0 : i32, i32
  }
  func.func @transform_8(%arg0: i32) -> (i32, i32) {
    %c0_i32 = arith.constant 0 : i32
    %c0_i32_0 = arith.constant 0 : i32
    return %c0_i32, %arg0 : i32, i32
  }
}

</mosaic_0001>

<bundles_post_ra>
// kernel: classifier_forward.1
= control target key start
LH: loop header
LB: loop body
LE: loop exit
PB: predicated region body
PF: predicated region fallthrough
CT: control target
= control target key end

     0   :  { %s1528_s0 = inlined_call_operand.vmem [shape: f32[200,13], index: 0, kind: input, shape index: {}]   ;;  %s1529_s1 = inlined_call_operand.vmem [shape: f32[80,13], index: 1, kind: input, shape index: {}]   ;;  %s1530_s2 = inlined_call_operand.vmem [shape: f32[80,1], index: 2, kind: input, shape index: {}]   ;;  %s1531_s3 = inlined_call_operand.vmem [shape: f32[30,80], index: 3, kind: input, shape index: {}]   ;;  %s1532_s4 = inlined_call_operand.vmem [shape: f32[30,1], index: 4, kind: input, shape index: {}]   ;;  %s1533_s5 = inlined_call_operand.vmem [shape: f32[30,1], index: 5, kind: input, shape index: {}]   ;;  %s1534_s6 = inlined_call_operand.<no memory space> [shape: f32[1,1], index: 6, kind: input, shape index: {}]   ;;  %s1535_s7 = inlined_call_operand.hbm [shape: f32[1,200], index: 7, kind: output, shape index: {0}]   ;;  %s1536_s8 = inlined_call_operand.hbm [shape: f32[1,200], index: 8, kind: output, shape index: {1}]  }
   0x1   :  { %v14_v0 = vstv %s1534_s6 }
   0x2   :  { %15 = vst [vmem:[#allocation2] sm:$0x1] %v14_v0 }
   0x3   :  { %16 = vsyncpa [#allocation4], 0 }
   0x4   :  { %18 = vsyncpa [#allocation4 + $0x1], 0 }
   0x5   :  { %19 = vsyncpa [#allocation6], 0 }
   0x6   :  { %21 = vsyncpa [#allocation6 + $0x1], 0  ;;  %s1207_s29 = smov 0   ;;  %s1209_s30 = smov 0  }
   0x7   :  { %s1211_s9 = smov 0   ;;  %s1213_s10 = smov 0  }
   0x8 LB: > { %s1228_s6 = sadd.s32 4294967295, %s1156_s10   ;;  %s898_s11 = sadd.s32 4294967294, %s1156_s10   ;;  %s1156_s10 = sphi %s1213_s10, %s1542_s10   ;;  %s1152_s9 = sphi %s1211_s9, %s1541_s9   ;;  %s1148_s30 = sphi %s1209_s30, %s1540_s30   ;;  %s1144_s29 = sphi %s1207_s29, %s1539_s29  }
   0x9   : > { %s1232_s12 = sadd.s32 1, %s1156_s10   ;;  %s186_s13 = sadd.s32 1, %s1152_s9 }
   0xa   : > { %s183_s14 = ssub.s32 %s1156_s10, %s1232_s12  ;;  %p196_p0 = scmp.ne.s32.totalorder %s1152_s9, %s1148_s30 }
   0xb   : > { %p184_p1 = scmp.eq.s32.totalorder %s183_s14, 0  ;;  %p197_p2 = scmp.eq.s32.totalorder %s1228_s6, 1 }
   0xc   : > { %p202_p3 = scmp.ne.s32.totalorder %s1148_s30, %s1144_s29  ;;  %p203_p4 = scmp.eq.s32.totalorder %s898_s11, 1 }
   0xd   : > { %s1243_s15 = scalar_select %p184_p1, %s1152_s9, %s186_s13  }
   0xe   : > { %p1245_p5 = por %p197_p2, %p196_p0  ;;  %p1249_p6 = por %p203_p4, %p202_p3 }
   0xf   : > { %p901_p7 = scmp.ge.s32.totalorder %s1156_s10, 1  ;;  %p282_p8 = scmp.lt.s32.totalorder %s1156_s10, 3 }
  0x11   : > { %p283_p9 = pnand %p901_p7, %p282_p8 }
  0x12   : > { %s902_s18 = sshll.u32 (!%p283_p9), %s1228_s6, 4  ;;  %s1477_s14 = sand.u32 (!%p283_p9), 1, %s1148_s30  }
  0x13   : > { %286 = sbr.rel (%p283_p9) target bundleno = 520 (0x208), region = 48  ;;  %p328_p10 = scmp.lt.s32.totalorder (!%p283_p9), %s902_s18, 24 }
  0x14   : > { %s811_s20 = scalar_lea.hbm (!%p283_p9), %s1536_s8, %s1228_s6  ;;  %s322_s21 = scalar_lea.vmem (!%p283_p9), [#allocation5], %s1477_s14 }
  0x15   : > { %s813_s23 = sshll.u32 (!%p283_p9), %s322_s21, 4  ;;  %s815_s24 = sshll.u32 (!%p283_p9), %s811_s20, 4  ;;  %s814_s23 = int_to_ptr.vmem [resolvable:$true] %s813_s23  ;;  %s816_s24 = int_to_ptr.hbm [resolvable:$true] %s815_s24 }
  0x16   : > { %s790_s25 = scalar_lea.sflag (!%p283_p9), [#allocation6], %s1477_s14  ;;  %s1076_s26 = sshra.s32 (!%p283_p9), %s816_s24, 4  ;;  %s1077_s26 = int_to_ptr.hbm [resolvable:$true] %s1076_s26 }
  0x17   : > { %s1078_s27 = scalar_lea.hbm (!%p283_p9), %s1077_s26, 1  ;;  %s1082_s11 = scalar_lea.hbm (!%p283_p9), %s1536_s8, 2 }
  0x18   : > { %s1544_s18 = smov (!%p328_p10, %s902_s18), 24  ;;  %vm423_vm0 = vcmask 105472   ;;  %v372_v10 = vld [vmem:[%s1530_s2 + $0x48] sm:$0xff]  ;;  %v1158_v12 = vmov 0   ;;  %v371_v14 = vld [vmem:[%s1530_s2 + $0x40] sm:$0xff]  ;;  %v370_v15 = vld [vmem:[%s1530_s2 + $0x38] sm:$0xff]  ;;  %p1079_p11 = scmp.ne.s32.totalorder %s1077_s26, %s1078_s27 }
  0x19   : > { %s903_s19 = sshll.u32 %s1544_s18, 3  ;;  %1027 = vset.pattern.permute.xlu0 %v1158_v12  ;;  %1028 = vset.pattern.permute.xlu1 %v1158_v12  ;;  %v366_v18 = vld [vmem:[%s1530_s2 + $0x18] sm:$0xff]  ;;  %v369_v19 = vld [vmem:[%s1530_s2 + $0x30] sm:$0xff]  ;;  %v363_v22 = vld [vmem:[%s1530_s2] sm:$0xff]  ;;  %vm647_vm11 = vcmask 654336   ;;  %p1083_p0 = scmp.lt.s32.totalorder %s1077_s26, %s1536_s8 }
  0x1a   : > { %s1259_s22 = scalar_lea.vmem %s1528_s0, %s903_s19  ;;  %420 = vperm.xlu0 %1027, %v372_v10   ;;  %1029 = vset.pattern.permute.xlu2 %v1158_v12  ;;  %v365_v23 = vld [vmem:[%s1530_s2 + $0x10] sm:$0xff]  ;;  %v341_v25 = vld [vmem:[%s1529_s1 + $0x20] sm:$0xff]  ;;  %v338_v26 = vld [vmem:[%s1529_s1 + $0x8] sm:$0xff]  ;;  %p1080_p12 = pnand %p1079_p11, %p1245_p5 }
  0x1b   : > { %v362_v1 = vld [vmem:[%s1259_s22 + $0x78] sm:$0xff]  ;;  %v361_v2 = vld [vmem:[%s1259_s22 + $0x70] sm:$0xff]  ;;  %v360_v3 = vld [vmem:[%s1259_s22 + $0x68] sm:$0xff]  ;;  %410 = vperm.xlu1 %1028, %v370_v15   ;;  %p1084_p1 = scmp.lt.s32.totalorder %s1082_s11, %s1078_s27 }
  0x1c   : > { %951 = vmatpush.xpose.msk.msra.mxu3 %vm423_vm0, %v362_v1  ;;  %950 = vmatpush.xpose.msk.msra.mxu2 %vm423_vm0, %v362_v1  ;;  %v359_v4 = vld [vmem:[%s1259_s22 + $0x60] sm:$0xff]  ;;  %v358_v5 = vld [vmem:[%s1259_s22 + $0x58] sm:$0xff]  ;;  %v357_v6 = vld [vmem:[%s1259_s22 + $0x50] sm:$0xff]  ;;  %p1081_p13 = pneg %p1080_p12 }
  0x1d   : > { %904 = vmatpush.xpose.msk.msra.mxu0 %vm423_vm0, %v362_v1  ;;  %v356_v7 = vld [vmem:[%s1259_s22 + $0x48] sm:$0xff]  ;;  %v355_v8 = vld [vmem:[%s1259_s22 + $0x40] sm:$0xff]  ;;  %v354_v9 = vld [vmem:[%s1259_s22 + $0x38] sm:$0xff]  ;;  %p1085_p2 = por %p1084_p1, %p1083_p0 }
  0x1e   : > { %v353_v11 = vld [vmem:[%s1259_s22 + $0x30] sm:$0xff]  ;;  %v352_v13 = vld [vmem:[%s1259_s22 + $0x28] sm:$0xff]  ;;  %v351_v16 = vld [vmem:[%s1259_s22 + $0x20] sm:$0xff] }
  0x1f   : > { %v350_v17 = vld [vmem:[%s1259_s22 + $0x18] sm:$0xff]  ;;  %v349_v20 = vld [vmem:[%s1259_s22 + $0x10] sm:$0xff]  ;;  %v348_v21 = vld [vmem:[%s1259_s22 + $0x8] sm:$0xff]  ;;  %p1086_p3 = pnand %p1085_p2, %p1081_p13 }
  0x20   : > { %953 = vmatpush.xpose.msk.msra.mxu3 %vm423_vm0, %v361_v2  ;;  %952 = vmatpush.xpose.msk.msra.mxu2 %vm423_vm0, %v361_v2  ;;  %v347_v24 = vld [vmem:[%s1259_s22] sm:$0xff]  ;;  %v368_v28 = vld [vmem:[%s1530_s2 + $0x28] sm:$0xff]  ;;  %v625_v29 = vld [vmem:[%s1532_s4 + $0x10] sm:$0xff] }
  0x21   : > { %905 = vmatpush.xpose.msk.msra.mxu0 %vm423_vm0, %v361_v2  ;;  %v337_v27 = vld [vmem:[%s1529_s1] sm:$0xff]  ;;  %400 = vperm.xlu2 %1029, %v368_v28   ;;  %v342_v31 = vld [vmem:[%s1529_s1 + $0x28] sm:$0xff]  ;;  %v339_v32 = vld [vmem:[%s1529_s1 + $0x10] sm:$0xff] }
  0x22   : > { %415 = vperm.xlu0 %1027, %v371_v14   ;;  %v623_v30 = vld [vmem:[%s1532_s4] sm:$0xff]  ;;  %v718_v34 = vld [vmem:[%s1533_s5 + $0x8] sm:$0xff]  ;;  %v626_v35 = vld [vmem:[%s1532_s4 + $0x18] sm:$0x3f] }
  0x23   : > { %405 = vperm.xlu1 %1028, %v369_v19   ;;  %v367_v33 = vld [vmem:[%s1530_s2 + $0x20] sm:$0xff]  ;;  %v343_v36 = vld [vmem:[%s1529_s1 + $0x30] sm:$0xff]  ;;  %v340_v37 = vld [vmem:[%s1529_s1 + $0x18] sm:$0xff] }
  0x24   : > { %955 = vmatpush.xpose.msk.msra.mxu3 %vm423_vm0, %v360_v3  ;;  %954 = vmatpush.xpose.msk.msra.mxu2 %vm423_vm0, %v360_v3  ;;  %v364_v38 = vld [vmem:[%s1530_s2 + $0x8] sm:$0xff]  ;;  %v719_v39 = vld [vmem:[%s1533_s5 + $0x10] sm:$0xff]  ;;  %v756_v40 = vld [vmem:[#allocation2] sm:$0x1] }
  0x25   : > { %906 = vmatpush.xpose.msk.msra.mxu0 %vm423_vm0, %v360_v3  ;;  %v344_v41 = vld [vmem:[%s1529_s1 + $0x38] sm:$0xff]  ;;  %v624_v42 = vld [vmem:[%s1532_s4 + $0x8] sm:$0xff]  ;;  %v345_v43 = vld [vmem:[%s1529_s1 + $0x40] sm:$0xff] }
  0x26   : > { %v717_v44 = vld [vmem:[%s1533_s5] sm:$0xff]  ;;  %v346_v45 = vld [vmem:[%s1529_s1 + $0x48] sm:$0xff]  ;;  %v720_v46 = vld [vmem:[%s1533_s5 + $0x18] sm:$0x3f] }
  0x28   : > { %957 = vmatpush.xpose.msk.msra.mxu3 %vm423_vm0, %v359_v4  ;;  %956 = vmatpush.xpose.msk.msra.mxu2 %vm423_vm0, %v359_v4 }
  0x29   : > { %907 = vmatpush.xpose.msk.msra.mxu0 %vm423_vm0, %v359_v4  ;;  %395 = vperm.xlu2 %1029, %v367_v33  }
  0x2a   : > { %390 = vperm.xlu0 %1027, %v366_v18  }
  0x2b   : > { %385 = vperm.xlu1 %1028, %v365_v23  }
  0x2c   : > { %959 = vmatpush.xpose.msk.msra.mxu3 %vm423_vm0, %v358_v5  ;;  %958 = vmatpush.xpose.msk.msra.mxu2 %vm423_vm0, %v358_v5 }
  0x2d   : > { %908 = vmatpush.xpose.msk.msra.mxu0 %vm423_vm0, %v358_v5 }
  0x30   : > { %961 = vmatpush.xpose.msk.msra.mxu3 %vm423_vm0, %v357_v6  ;;  %960 = vmatpush.xpose.msk.msra.mxu2 %vm423_vm0, %v357_v6 }
  0x31   : > { %909 = vmatpush.xpose.msk.msra.mxu0 %vm423_vm0, %v357_v6  ;;  %380 = vperm.xlu2 %1029, %v364_v38  }
  0x32   : > { %375 = vperm.xlu0 %1027, %v363_v22  }
  0x33   : > { %629 = vperm.xlu1 %1028, %v623_v30  }
  0x34   : > { %963 = vmatpush.xpose.msk.msra.mxu3 %vm423_vm0, %v356_v7  ;;  %962 = vmatpush.xpose.msk.msra.mxu2 %vm423_vm0, %v356_v7 }
  0x35   : > { %910 = vmatpush.xpose.msk.msra.mxu0 %vm423_vm0, %v356_v7 }
  0x38   : > { %965 = vmatpush.xpose.msk.msra.mxu3 %vm423_vm0, %v355_v8  ;;  %964 = vmatpush.xpose.msk.msra.mxu2 %vm423_vm0, %v355_v8 }
  0x39   : > { %911 = vmatpush.xpose.msk.msra.mxu0 %vm423_vm0, %v355_v8  ;;  %634 = vperm.xlu2 %1029, %v624_v42  }
  0x3a   : > { %639 = vperm.xlu0 %1027, %v625_v29  }
  0x3b   : > { %644 = vperm.xlu1 %1028, %v626_v35  }
  0x3c   : > { %967 = vmatpush.xpose.msk.msra.mxu3 %vm423_vm0, %v354_v9  ;;  %966 = vmatpush.xpose.msk.msra.mxu2 %vm423_vm0, %v354_v9 }
  0x3d   : > { %912 = vmatpush.xpose.msk.msra.mxu0 %vm423_vm0, %v354_v9 }
  0x40   : > { %969 = vmatpush.xpose.msk.msra.mxu3 %vm423_vm0, %v353_v11  ;;  %968 = vmatpush.xpose.msk.msra.mxu2 %vm423_vm0, %v353_v11 }
  0x41   : > { %913 = vmatpush.xpose.msk.msra.mxu0 %vm423_vm0, %v353_v11  ;;  %723 = vperm.xlu2 %1029, %v717_v44  }
  0x42   : > { %728 = vperm.xlu0 %1027, %v718_v34  }
  0x43   : > { %733 = vperm.xlu1 %1028, %v719_v39  }
  0x44   : > { %971 = vmatpush.xpose.msk.msra.mxu3 %vm423_vm0, %v352_v13  ;;  %970 = vmatpush.xpose.msk.msra.mxu2 %vm423_vm0, %v352_v13 }
  0x45   : > { %914 = vmatpush.xpose.msk.msra.mxu0 %vm423_vm0, %v352_v13 }
  0x48   : > { %973 = vmatpush.xpose.msk.msra.mxu3 %vm423_vm0, %v351_v16  ;;  %972 = vmatpush.xpose.msk.msra.mxu2 %vm423_vm0, %v351_v16 }
  0x49   : > { %915 = vmatpush.xpose.msk.msra.mxu0 %vm423_vm0, %v351_v16  ;;  %738 = vperm.xlu2 %1029, %v720_v46  }
  0x4a   : > { %759 = vperm.xlu0 %1027, %v756_v40  }
  0x4c   : > { %975 = vmatpush.xpose.msk.msra.mxu3 %vm423_vm0, %v350_v17  ;;  %974 = vmatpush.xpose.msk.msra.mxu2 %vm423_vm0, %v350_v17 }
  0x4d   : > { %916 = vmatpush.xpose.msk.msra.mxu0 %vm423_vm0, %v350_v17 }
  0x50   : > { %977 = vmatpush.xpose.msk.msra.mxu3 %vm423_vm0, %v349_v20  ;;  %976 = vmatpush.xpose.msk.msra.mxu2 %vm423_vm0, %v349_v20 }
  0x51   : > { %917 = vmatpush.xpose.msk.msra.mxu0 %vm423_vm0, %v349_v20 }
  0x54   : > { %979 = vmatpush.xpose.msk.msra.mxu3 %vm423_vm0, %v348_v21  ;;  %978 = vmatpush.xpose.msk.msra.mxu2 %vm423_vm0, %v348_v21 }
  0x55   : > { %918 = vmatpush.xpose.msk.msra.mxu0 %vm423_vm0, %v348_v21 }
  0x58   : > { %981 = vmatpush.xpose.msk.msra.mxu3 %vm423_vm0, %v347_v24  ;;  %980 = vmatpush.xpose.msk.msra.mxu2 %vm423_vm0, %v347_v24 }
  0x59   : > { %919 = vmatpush.xpose.msk.msra.mxu0 %vm423_vm0, %v347_v24 }
  0x5b   : > { %924 = vmatmul.msk.f32.vlgmr.msra.gmra.mxu3 %vm423_vm0, %v341_v25  ;;  %921 = vmatmul.msk.f32.vlgmr.msra.gmra.mxu2 %vm423_vm0, %v338_v26 }
  0x5c   : > { %920 = vmatmul.msk.f32.vlgmr.msra.gmra.mxu0 %vm423_vm0, %v337_v27 }
  0x63   : > { %925 = vmatmul.msk.f32.gmra.mxu3 %vm423_vm0, %v342_v31  ;;  %922 = vmatmul.msk.f32.gmra.mxu2 %vm423_vm0, %v339_v32 }
  0x6b   : > { %926 = vmatmul.msk.f32.gmra.mxu3 %vm423_vm0, %v343_v36  ;;  %923 = vmatmul.msk.f32.gmra.mxu2 %vm423_vm0, %v340_v37 }
  0x73   : > { %927 = vmatmul.msk.f32.gmra.mxu3 %vm423_vm0, %v344_v41 }
  0x7b   : > { %928 = vmatmul.msk.f32.gmra.mxu3 %vm423_vm0, %v345_v43  ;;  %v401_v54 = vpop.permute.xlu2 %400 }
  0x83   : > { %929 = vmatmul.msk.f32.gmra.mxu3 %vm423_vm0, %v346_v45  ;;  %v396_v62 = vpop.permute.xlu2 %395  ;;  %vm747_vm0 = vcmask 1045504  }
  0x8b   : > { %v381_v16 = vpop.permute.xlu2 %380 }
  0x8c   : > { %v421_v49 = vpop.permute.xlu0 %420 }
  0x8d   : > { %v411_v52 = vpop.permute.xlu1 %410 }
  0x94   : > { %v416_v55 = vpop.permute.xlu0 %415 }
  0x95   : > { %v406_v57 = vpop.permute.xlu1 %405 }
  0x9c   : > { %v391_v0 = vpop.permute.xlu0 %390 }
  0x9d   : > { %v386_v12 = vpop.permute.xlu1 %385 }
  0xa4   : > { %v376_v23 = vpop.permute.xlu0 %375 }
  0xd9   : > { %v519_v19 = vpop.f32.mrf.mxu0 }
  0xda   : > { %v1442_v26 = vadd.f32 %v519_v19, %v376_v23 }
  0xdc   : > { %v559_v32 = vmin.f32 %v1442_v26, 0.0  ;;  %vm549_vm10 = vcmp.gt.f32.partialorder %v1442_v26, 0.0 }
  0xde   : > { %v531_v47 = vpop.f32.mrf.mxu3  ;;  %v522_v51 = vpop.f32.mrf.mxu2  ;;  %v569_v40 = vmul.f32 1.442695, %v559_v32 }
  0xdf   : > { %v1430_v5 = vadd.f32 %v531_v47, %v396_v62  ;;  %v1438_v18 = vadd.f32 %v522_v51, %v381_v16 }
  0xe1   : > { %v563_v14 = vmin.f32 %v1430_v5, 0.0  ;;  %v560_v28 = vmin.f32 %v1438_v18, 0.0  ;;  %vm553_vm6 = vcmp.gt.f32.partialorder %v1430_v5, 0.0  ;;  %vm550_vm9 = vcmp.gt.f32.partialorder %v1438_v18, 0.0 }
  0xe3   : > { %v577_v24 = vmul.f32 1.442695, %v563_v14  ;;  %v571_v36 = vmul.f32 1.442695, %v560_v28  ;;  %v630_v14 = vpop.permute.xlu1 %629 }
  0xe6   : > { %v534_v48 = vpop.f32.mrf.mxu3  ;;  %v525_v56 = vpop.f32.mrf.mxu2 }
  0xe7   : > { %v1426_v1 = vadd.f32 %v534_v48, %v401_v54  ;;  %v1436_v15 = vadd.f32 %v525_v56, %v386_v12  ;;  %v622_v12 = vld [vmem:[%s1531_s3 + $0x18] sm:$0x3f] }
  0xe9   : > { %v564_v8 = vmin.f32 %v1426_v1, 0.0  ;;  %v561_v25 = vmin.f32 %v1436_v15, 0.0  ;;  %vm554_vm5 = vcmp.gt.f32.partialorder %v1426_v1, 0.0  ;;  %vm551_vm8 = vcmp.gt.f32.partialorder %v1436_v15, 0.0 }
  0xeb   : > { %v579_v20 = vmul.f32 1.442695, %v564_v8  ;;  %v573_v31 = vmul.f32 1.442695, %v561_v25 }
  0xee   : > { %v537_v50 = vpop.f32.mrf.mxu3  ;;  %v528_v4 = vpop.f32.mrf.mxu2 }
  0xef   : > { %v1423_v61 = vadd.f32 %v537_v50, %v406_v57  ;;  %v1433_v9 = vadd.f32 %v528_v4, %v391_v0 }
  0xf1   : > { %v565_v3 = vmin.f32 %v1423_v61, 0.0  ;;  %v562_v21 = vmin.f32 %v1433_v9, 0.0  ;;  %vm555_vm4 = vcmp.gt.f32.partialorder %v1423_v61, 0.0  ;;  %vm552_vm7 = vcmp.gt.f32.partialorder %v1433_v9, 0.0 }
  0xf3   : > { %v581_v13 = vmul.f32 1.442695, %v565_v3  ;;  %v575_v29 = vmul.f32 1.442695, %v562_v21 }
  0xf6   : > { %v540_v53 = vpop.f32.mrf.mxu3 }
  0xf7   : > { %v1419_v59 = vadd.f32 %v540_v53, %v411_v52 }
  0xf9   : > { %v566_v2 = vmin.f32 %v1419_v59, 0.0  ;;  %vm556_vm3 = vcmp.gt.f32.partialorder %v1419_v59, 0.0 }
  0xfb   : > { %v583_v10 = vmul.f32 1.442695, %v566_v2 }
  0xfe   : > { %v543_v58 = vpop.f32.mrf.mxu3 }
  0xff   : > { %v1421_v60 = vadd.f32 %v543_v58, %v416_v55 }
 0x101   : > { %v567_v63 = vmin.f32 %v1421_v60, 0.0  ;;  %vm557_vm2 = vcmp.gt.f32.partialorder %v1421_v60, 0.0 }
 0x103   : > { %v585_v6 = vmul.f32 1.442695, %v567_v63 }
 0x105   : > { %1030 = vpow2.f32 %v585_v6 }
 0x106   : > { %v546_v7 = vpop.f32.mrf.mxu3  ;;  %1032 = vpow2.f32 %v583_v10  ;;  %v620_v10 = vld [vmem:[%s1531_s3 + $0x8] sm:$0xff] }
 0x107   : > { %v547_v11 = vadd.f32 %v546_v7, %v421_v49  ;;  %1034 = vpow2.f32 %v581_v13 }
 0x109   : > { %v568_v17 = vmin.f32 %v547_v11, 0.0  ;;  %vm558_vm1 = vcmp.gt.f32.partialorder %v547_v11, 0.0 }
 0x10b   : > { %v587_v22 = vmul.f32 1.442695, %v568_v17  ;;  %v1031_v27 = vpop.eup %1030 }
 0x10c   : > { %v1033_v30 = vpop.eup %1032  ;;  %v938_v34 = vadd.f32 -1.0, %v1031_v27 }
 0x10d   : > { %1036 = vpow2.f32 %v587_v22  ;;  %v1035_v33 = vpop.eup %1034  ;;  %v937_v38 = vadd.f32 -1.0, %v1033_v30  ;;  %v640_v22 = vpop.permute.xlu0 %639 }
 0x10e   : > { %1038 = vpow2.f32 %v579_v20  ;;  %v607_v42 = vmul.f32 1.6732632, %v938_v34  ;;  %v936_v43 = vadd.f32 -1.0, %v1035_v33 }
 0x10f   : > { %1040 = vpow2.f32 %v577_v24  ;;  %v606_v46 = vmul.f32 1.6732632, %v937_v38 }
 0x110   : > { %1042 = vpow2.f32 %v575_v29  ;;  %v617_v49 = vsel %vm557_vm2, %v1421_v60, %v607_v42  ;;  %v605_v50 = vmul.f32 1.6732632, %v936_v43  ;;  %v645_v29 = vpop.permute.xlu1 %644 }
 0x111   : > { %1044 = vpow2.f32 %v573_v31  ;;  %v616_v53 = vsel %vm556_vm3, %v1419_v59, %v606_v46 }
 0x112   : > { %1046 = vpow2.f32 %v571_v36  ;;  %v615_v57 = vsel %vm555_vm4, %v1423_v61, %v605_v50 }
 0x113   : > { %v1037_v35 = vpop.eup %1036  ;;  %1048 = vpow2.f32 %v569_v40 }
 0x114   : > { %v939_v37 = vadd.f32 -1.0, %v1037_v35  ;;  %v1039_v39 = vpop.eup %1038 }
 0x115   : > { %v1041_v44 = vpop.eup %1040  ;;  %v935_v47 = vadd.f32 -1.0, %v1039_v39 }
 0x116   : > { %v608_v41 = vmul.f32 1.6732632, %v939_v37  ;;  %v1043_v48 = vpop.eup %1042  ;;  %v934_v51 = vadd.f32 -1.0, %v1041_v44 }
 0x117   : > { %v1045_v52 = vpop.eup %1044  ;;  %v604_v54 = vmul.f32 1.6732632, %v935_v47  ;;  %v933_v55 = vadd.f32 -1.0, %v1043_v48 }
 0x118   : > { %v618_v45 = vsel %vm558_vm1, %v547_v11, %v608_v41  ;;  %v1047_v56 = vpop.eup %1046  ;;  %v603_v58 = vmul.f32 1.6732632, %v934_v51  ;;  %v932_v62 = vadd.f32 -1.0, %v1045_v52  ;;  %v621_v11 = vld [vmem:[%s1531_s3 + $0x10] sm:$0xff]  ;;  %v734_v50 = vpop.permute.xlu1 %733 }
 0x119   : > { %666 = vmatpush.msra.mxu1 %v618_v45  ;;  %v1049_v63 = vpop.eup %1048  ;;  %v614_v60 = vsel %vm554_vm5, %v1426_v1, %v604_v54  ;;  %v602_v0 = vmul.f32 1.6732632, %v933_v55  ;;  %v931_v2 = vadd.f32 -1.0, %v1047_v56  ;;  %v729_v45 = vpop.permute.xlu0 %728 }
 0x11a   : > { %v613_v59 = vsel %vm553_vm6, %v1430_v5, %v603_v58  ;;  %v601_v3 = vmul.f32 1.6732632, %v932_v62  ;;  %v930_v4 = vadd.f32 -1.0, %v1049_v63  ;;  %v619_v5 = vld [vmem:[%s1531_s3] sm:$0xff] }
 0x11b   : > { %667 = vmatpush.msra.mxu1 %v617_v49  ;;  %v612_v61 = vsel %vm552_vm7, %v1433_v9, %v602_v0  ;;  %v600_v6 = vmul.f32 1.6732632, %v931_v2 }
 0x11c   : > { %v611_v1 = vsel %vm551_vm8, %v1436_v15, %v601_v3  ;;  %v599_v7 = vmul.f32 1.6732632, %v930_v4  ;;  %v635_v15 = vpop.permute.xlu2 %634 }
 0x11d   : > { %668 = vmatpush.msra.mxu1 %v616_v53  ;;  %v610_v8 = vsel %vm550_vm9, %v1438_v18, %v600_v6 }
 0x11e   : > { %v609_v9 = vsel %vm549_vm10, %v1442_v26, %v599_v7 }
 0x11f   : > { %669 = vmatpush.msra.mxu1 %v615_v57 }
 0x121   : > { %670 = vmatpush.msra.mxu1 %v614_v60  ;;  %v760_v3 = vpop.permute.xlu0 %759 }
 0x123   : > { %671 = vmatpush.msra.mxu1 %v613_v59 }
 0x124   : > { %v724_v40 = vpop.permute.xlu2 %723 }
 0x125   : > { %672 = vmatpush.msra.mxu1 %v612_v61  ;;  %v762_v61 = vperm.slane %v760_v3, 0 }
 0x127   : > { %673 = vmatpush.msra.mxu1 %v611_v1 }
 0x129   : > { %674 = vmatpush.msra.mxu1 %v610_v8 }
 0x12b   : > { %675 = vmatpush.msra.mxu1 %v609_v9 }
 0x12c   : > { %940 = vmatmul.msk.f32.vlgmr.msra.gmra.mxu1 %vm647_vm11, %v619_v5  ;;  %v739_v54 = vpop.permute.xlu2 %738 }
 0x134   : > { %941 = vmatmul.msk.f32.gmra.mxu1 %vm647_vm11, %v620_v10 }
 0x13c   : > { %942 = vmatmul.msk.f32.gmra.mxu1 %vm647_vm11, %v621_v11 }
 0x144   : > { %943 = vmatmul.msk.f32.gmra.mxu1 %vm647_vm11, %v622_v12 }
 0x1a9   : > { %v677_v13 = vpop.f32.mrf.mxu1 }
 0x1aa   : > { %v678_v16 = vadd.f32 %v677_v13, %v630_v14 }
 0x1ac   : > { %v693_v20 = vmin.f32 %v678_v16, 0.0  ;;  %vm689_vm13 = vcmp.gt.f32.partialorder %v678_v16, 0.0 }
 0x1ae   : > { %v697_v23 = vmul.f32 1.442695, %v693_v20 }
 0x1b1   : > { %v680_v17 = vpop.f32.mrf.mxu1 }
 0x1b2   : > { %v681_v18 = vadd.f32 %v680_v17, %v635_v15 }
 0x1b4   : > { %v694_v19 = vmin.f32 %v681_v18, 0.0  ;;  %vm690_vm12 = vcmp.gt.f32.partialorder %v681_v18, 0.0 }
 0x1b6   : > { %v699_v21 = vmul.f32 1.442695, %v694_v19 }
 0x1b8   : > { %1050 = vpow2.f32 %v699_v21 }
 0x1b9   : > { %v683_v24 = vpop.f32.mrf.mxu1  ;;  %1052 = vpow2.f32 %v697_v23 }
 0x1ba   : > { %v684_v25 = vadd.f32 %v683_v24, %v640_v22 }
 0x1bc   : > { %v695_v26 = vmin.f32 %v684_v25, 0.0  ;;  %vm691_vm14 = vcmp.gt.f32.partialorder %v684_v25, 0.0 }
 0x1be   : > { %v701_v27 = vmul.f32 1.442695, %v695_v26  ;;  %v1051_v28 = vpop.eup %1050 }
 0x1bf   : > { %v1053_v32 = vpop.eup %1052  ;;  %v945_v33 = vadd.f32 -1.0, %v1051_v28 }
 0x1c0   : > { %1054 = vpow2.f32 %v701_v27  ;;  %v944_v36 = vadd.f32 -1.0, %v1053_v32 }
 0x1c1   : > { %v686_v30 = vpop.f32.mrf.mxu1  ;;  %v710_v39 = vmul.f32 1.6732632, %v945_v33 }
 0x1c2   : > { %v687_v31 = vadd.f32 %v686_v30, %v645_v29  ;;  %v709_v41 = vmul.f32 1.6732632, %v944_v36 }
 0x1c3   : > { %v714_v43 = vsel %vm690_vm12, %v681_v18, %v710_v39 }
 0x1c4   : > { %v696_v34 = vmin.f32 %v687_v31, 0.0  ;;  %v713_v46 = vsel %vm689_vm13, %v678_v16, %v709_v41  ;;  %v742_v48 = vmul.f32 %v729_v45, %v714_v43  ;;  %vm692_vm15 = vcmp.gt.f32.partialorder %v687_v31, 0.0 }
 0x1c5   : > { %v741_v51 = vmul.f32 %v724_v40, %v713_v46 }
 0x1c6   : > { %v1055_v35 = vpop.eup %1054  ;;  %v703_v37 = vmul.f32 1.442695, %v696_v34 }
 0x1c7   : > { %v946_v38 = vadd.f32 -1.0, %v1055_v35  ;;  %v745_v55 = vadd.f32 %v742_v48, %v741_v51 }
 0x1c8   : > { %1056 = vpow2.f32 %v703_v37 }
 0x1c9   : > { %v711_v42 = vmul.f32 1.6732632, %v946_v38 }
 0x1cb   : > { %v715_v47 = vsel %vm691_vm14, %v684_v25, %v711_v42 }
 0x1cc   : > { %v743_v52 = vmul.f32 %v734_v50, %v715_v47 }
 0x1ce   : > { %v1057_v44 = vpop.eup %1056  ;;  %v746_v58 = vadd.f32 %v745_v55, %v743_v52 }
 0x1cf   : > { %v947_v49 = vadd.f32 -1.0, %v1057_v44 }
 0x1d1   : > { %v712_v53 = vmul.f32 1.6732632, %v947_v49 }
 0x1d3   : > { %v716_v56 = vsel %vm692_vm15, %v687_v31, %v712_v53 }
 0x1d4   : > { %v744_v57 = vmul.f32 %v739_v54, %v716_v56 }
 0x1d6   : > { %v748_v62 = vsel %vm747_vm0, %v744_v57, 0.0 }
 0x1d7   : > { %v749_v63 = vadd.f32 %v748_v62, %v746_v58 }
 0x1d9   : > { %v750_v60 = vrot.slane %v749_v63, 4 }
 0x1db   : > { %v751_v0 = vadd.f32 %v750_v60, %v749_v63 }
 0x1dd   : > { %v752_v2 = vrot.slane %v751_v0, 2 }
 0x1df   : > { %v753_v59 = vadd.f32 %v752_v2, %v751_v0 }
 0x1e1   : > { %v754_v4 = vrot.slane %v753_v59, 1 }
 0x1e3   : > { %v755_v6 = vadd.f32 %v754_v4, %v753_v59 }
 0x1e5   : > { %v763_v1 = vadd.f32 %v762_v61, %v755_v6 }
 0x1e7   : > { %v764_v7 = vsub.f32 0.0, %v763_v1  ;;  %784 = vst [vmem:[%s322_s21] sm:$0x1] %v763_v1 }
 0x1e8   : > { %1089 = shalt.err (!%p1086_p3)
}
 0x1e9   : > { %983 = dma.vmem_to_hbm [thread:$0]  (%p1245_p5), %s814_s23, 16, %s816_s24, %s790_s25   ;;  %v765_v8 = vmul.f32 1.442695, %v764_v7 }
 0x1ea   : > { %s798_s21 = scalar_lea.hbm %s1535_s7, %s1228_s6  ;;  %s316_s26 = scalar_lea.vmem [#allocation3], %s1477_s14 }
 0x1eb   : > { %1058 = vpow2.f32 %v765_v8  ;;  %s800_s27 = sshll.u32 %s316_s26, 4  ;;  %s802_s23 = sshll.u32 %s798_s21, 4  ;;  %s801_s27 = int_to_ptr.vmem [resolvable:$true] %s800_s27  ;;  %s803_s23 = int_to_ptr.hbm [resolvable:$true] %s802_s23 }
 0x1ec   : > { %s786_s6 = scalar_lea.sflag [#allocation4], %s1477_s14  ;;  %s1104_s24 = sshra.s32 %s803_s23, 4  ;;  %s1105_s24 = int_to_ptr.hbm [resolvable:$true] %s1104_s24 }
 0x1ed   : > { %s1106_s25 = scalar_lea.hbm %s1105_s24, 1  ;;  %s1110_s11 = scalar_lea.hbm %s1535_s7, 2 }
 0x1ee   : > { %p1107_p4 = scmp.ne.s32.totalorder %s1105_s24, %s1106_s25  ;;  %p1111_p9 = scmp.lt.s32.totalorder %s1105_s24, %s1535_s7 }
 0x1ef   : > { %p1112_p10 = scmp.lt.s32.totalorder %s1110_s11, %s1106_s25 }
 0x1f0   : > { %p1108_p7 = pnand %p1107_p4, %p1245_p5 }
 0x1f1   : > { %v1059_v5 = vpop.eup %1058  ;;  %p1113_p11 = por %p1112_p10, %p1111_p9 }
 0x1f2   : > { %v767_v9 = vadd.f32 1.0, %v1059_v5  ;;  %p1109_p8 = pneg %p1108_p7 }
 0x1f4   : > { %1060 = vrcp.f32 %v767_v9  ;;  %v779_v13 = vand.u32 2147483648, %v767_v9  ;;  %v777_v15 = vand.u32 2147483647, %v767_v9  ;;  %vm773_vm2 = vweird.f32 %v767_v9  ;;  %p1114_p12 = pnand %p1113_p11, %p1109_p8 }
 0x1f6   : > { %v780_v17 = vor.u32 1.1754944e-38, %v779_v13  ;;  %vm778_vm4 = vcmp.eq.f32.partialorder %v777_v15, 8.507059e+37 }
 0x1fa   : > { %v1061_v10 = vpop.eup %1060 }
 0x1fb   : > { %v769_v11 = vmul.f32 %v1061_v10, %v767_v9  ;;  %vm774_vm1 = vweird.f32 %v1061_v10 }
 0x1fc   : > { %vm775_vm3 = vmor %vm773_vm2, %vm774_vm1 }
 0x1fd   : > { %v770_v12 = vsub.f32 1.0, %v769_v11 }
 0x1ff   : > { %v771_v14 = vmul.f32 %v1061_v10, %v770_v12 }
 0x201   : > { %v772_v16 = vadd.f32 %v1061_v10, %v771_v14 }
 0x203   : > { %v776_v18 = vsel %vm775_vm3, %v1061_v10, %v772_v16 }
 0x204   : > { %v781_v19 = vsel %vm778_vm4, %v780_v17, %v776_v18 }
 0x205   : > { %783 = vst [vmem:[%s316_s26] sm:$0x1] %v781_v19 }
 0x206   : > { %1117 = shalt.err (!%p1114_p12)
}
 0x207   : > { %982 = dma.vmem_to_hbm [thread:$0]  (%p1245_p5), %s801_s27, 16, %s803_s23, %s786_s6  }
 0x208 PF: > { %p993_p13 = scmp.ge.s32.totalorder %s1156_s10, 2  ;;  %s827_s14 = sand.u32 1, %s1144_s29  }
 0x209   : > { %s828_s19 = scalar_lea.sflag [#allocation4], %s827_s14 }
 0x20a   : > { %p987_p0 = pnand %p993_p13, %p1249_p6 }
 0x20c   : > { %p988_p1 = pneg %p987_p0 }
 0x20e   : > { %1135 = dma.done.wait (%p988_p1), %s828_s19, 16  }
 0x20f   : > { %1137 = vsyncadd (%p988_p1), %s828_s19, 4294967280  ;;  %s837_s20 = scalar_lea.sflag [#allocation6], %s827_s14 }
 0x210   : > { %1139 = dma.done.wait (%p988_p1), %s837_s20, 16  }
 0x211   : > { %1141 = vsyncadd (%p988_p1), %s837_s20, 4294967280  ;;  %p24_p5 = scmp.ge.s32.totalorder %s1232_s12, 4   ;;  %s1539_s29 = smov %s1148_s30 }
 0x212   : > { %s1540_s30 = smov %s1152_s9  ;;  %s1541_s9 = smov %s1243_s15 }
 0x213   : > { %s1542_s10 = smov %s1232_s12  ;;  %26 = sbr.rel (!%p24_p5) target bundleno = 8 (0x8), region = 100 }
 0x218   :  { %842 = vsyncpa [#allocation4], 1 }
 0x219   :  { %844 = vsyncpa [#allocation4 + $0x1], 1 }
 0x21a   :  { %845 = vsyncpa [#allocation6], 1 }
 0x21b   :  { %847 = vsyncpa [#allocation6 + $0x1], 1 }

</bundles_post_ra>
